<compile_context>
chip_gen: v7x
topology: tpu7x:2x2x1
jax: 0.10.0
libtpu: 0.0.40
codegen_flags: <defaults>
</compile_context>

<pallas_src>
import jax
import jax.numpy as jnp
from jax import lax
from jax.experimental import pallas as pl
from jax.experimental.pallas import tpu as pltpu

_LANE = 128
_SUBLANE = 8


def _round_up(x, m):
    return ((x + m - 1) // m) * m


def _vmem_capacity_bytes():
    try:
        return int(pltpu.get_tpu_info().vmem_capacity_bytes)
    except Exception:
        return 64 * 1024 * 1024  # v7x per-TensorCore VMEM; safe floor everywhere


def _choose_tile(n, c, itemsize, class_axis, tile_n=None):
    """Pick tile_n (samples per block) under a VMEM-footprint model."""
    vmem_cap = _vmem_capacity_bytes()
    budget = min(vmem_cap // 2, 40 * 1024 * 1024)   # pipeline + temporaries budget
    target_payload = 6 * 1024 * 1024                # ~6 MiB of logits per buffer

    if class_axis == 0:
        # (C, tile_n) blocks: batch on lanes, classes on (packed) sublanes.
        align = _LANE
        sub_pack = _SUBLANE * max(1, 4 // itemsize)          # bf16 packs 16 rows
        per_sample = (2 * _round_up(c, sub_pack) * itemsize  # 2x logits buffers
                      + 6 * _round_up(c, _SUBLANE) * 4       # ~6 f32 temporaries
                      + 2 * _SUBLANE * 4)                    # 2x targets buffers
        hard_cap = 1 << 17
    else:
        # (tile_n, C) blocks: classes on (128-padded) lanes.
        align = _SUBLANE
        per_sample = (2 * _round_up(c, _LANE) * itemsize
                      + 6 * _round_up(c, _LANE) * 4
                      + 2 * _LANE * 4)                       # (tile,1) i32 lane-padded
        hard_cap = 32768

    if tile_n is None:
        tile_n = min(target_payload // max(1, c * itemsize),
                     budget // per_sample, hard_cap)
    tile_n = int(tile_n)
    if tile_n >= n:
        tile_n = n                                  # one full-extent block (always legal)
    else:
        tile_n = max(align, (tile_n // align) * align)

    vmem_need = per_sample * tile_n + (4 << 20)     # + out / iota / misc slack
    vmem_limit = int(min(vmem_cap - (16 << 20),
                         max(vmem_need + (8 << 20), 32 << 20)))
    return tile_n, vmem_limit


def _make_focal_loss_kernel(n_total, tile_n, tiles_per_shard, gamma, class_axis):
    """class_axis == 0 -> block (C, tile_n)   (batch on lanes;  C < 128 path)
       class_axis == 1 -> block (tile_n, C)   (classes on lanes; C >= 128 path)"""
    batch_axis = 1 - class_axis

    def kernel(logits_ref, targets_ref, out_ref):
        p = pl.program_id(0)      # shard axis ("parallel", megacore on v7x)
        i = pl.program_id(1)      # batch-tile axis ("arbitrary", reduction)

        # Init the resident per-shard accumulator (output block) once per shard.
        @pl.when(i == 0)
        def _init():
            out_ref[...] = jnp.zeros_like(out_ref)

        # Ingest in storage dtype (bf16 halves HBM traffic), upcast on-chip.
        logits = logits_ref[...].astype(jnp.float32)
        targets = targets_ref[...]                        # int32
        c = logits.shape[class_axis]

        # Numerically stable CE: ce = log(sum(exp(x - m))) - (x[target] - m).
        row_max = jnp.max(logits, axis=class_axis, keepdims=True)
        shifted = logits - row_max
        sum_exp = jnp.sum(jnp.exp(shifted), axis=class_axis, keepdims=True)

        # One-hot gather of the (shifted) target logit; iota kept minimal and
        # broadcast inside the compare (no full-tile iota per step).
        iota_shape = (c, 1) if class_axis == 0 else (1, c)
        class_ids = lax.broadcasted_iota(jnp.int32, iota_shape, class_axis)
        onehot = class_ids == targets                     # broadcasts to block shape
        tgt_shifted = jnp.sum(jnp.where(onehot, shifted, 0.0),
                              axis=class_axis, keepdims=True)

        ce = jnp.log(sum_exp) - tgt_shifted               # >= 0
        pt = jnp.exp(-ce)
        one_minus_pt = jnp.maximum(1.0 - pt, 0.0)         # clamp FP noise

        if gamma == 1.5:
            modulator = one_minus_pt * jnp.sqrt(one_minus_pt)   # sqrt -> EUP
        elif gamma == 2.0:
            modulator = one_minus_pt * one_minus_pt
        elif gamma == 1.0:
            modulator = one_minus_pt
        elif gamma == 0.0:
            modulator = jnp.ones_like(one_minus_pt)
        else:
            modulator = jnp.power(one_minus_pt, jnp.float32(gamma))

        focal = modulator * ce

        # Mask samples past the true batch end: covers the ragged last tile
        # AND the duplicated (index-clamped) tiles of the shard split.
        tile_idx = p * tiles_per_shard + i
        sample_ids = tile_idx * tile_n + lax.broadcasted_iota(
            jnp.int32, focal.shape, batch_axis)
        focal = jnp.where(sample_ids < n_total, focal, 0.0)

        out_ref[...] += jnp.sum(focal, keepdims=True)

    return kernel


def focal_loss(logits, targets, alpha=None, gamma=1.5, reduction="mean",
               tile_n=None):
    """Pallas focal loss.  logits: (N, C) f32/bf16; targets: (N,) int class ids."""
    assert alpha is None, "alpha (class weights) not implemented"
    # TODO(synk): support alpha class weights (per-sample ce *= alpha[target]).
    assert reduction in ("mean", "sum"), "reduction='none' not implemented"
    # TODO(synk): reduction='none' needs a per-sample (N,) output block instead.

    n, c = logits.shape
    itemsize = jnp.dtype(logits.dtype).itemsize
    targets = jnp.asarray(targets).reshape(-1).astype(jnp.int32)

    # Layout choice (see header): C < 128 -> transposed (C, N), batch on lanes.
    class_axis = 0 if c < _LANE else 1
    tile_n, vmem_limit = _choose_tile(n, c, itemsize, class_axis, tile_n)

    n_tiles = pl.cdiv(n, tile_n)
    num_shards = 2 if n_tiles >= 2 else 1           # megacore split (pays on v7x)
    tiles_per_shard = pl.cdiv(n_tiles, num_shards)
    last_tile = n_tiles - 1

    def _tile_idx(p, i):
        # Clamp so the DMA'd block always starts in bounds; duplicated tiles
        # are zeroed in the kernel via global sample-id masking.
        return jnp.minimum(p * tiles_per_shard + i, last_tile)

    if class_axis == 0:
        logits_in = logits.T                        # (C, N); free if producer emits it
        targets_in = targets.reshape(1, n)          # lane-dense, contiguous DMA
        in_specs = [
            pl.BlockSpec((c, tile_n), lambda p, i: (0, _tile_idx(p, i))),
            pl.BlockSpec((1, tile_n), lambda p, i: (0, _tile_idx(p, i))),
        ]
    else:
        logits_in = logits                          # (N, C) already lane-dense
        targets_in = targets.reshape(n, 1)
        in_specs = [
            pl.BlockSpec((tile_n, c), lambda p, i: (_tile_idx(p, i), 0)),
            pl.BlockSpec((tile_n, 1), lambda p, i: (_tile_idx(p, i), 0)),
        ]

    kernel = _make_focal_loss_kernel(n, tile_n, tiles_per_shard, float(gamma),
                                     class_axis)

    cost = pl.CostEstimate(
        flops=8 * n * c,
        transcendentals=n * c + 3 * n,
        bytes_accessed=n * c * itemsize + n * 4 + num_shards * 4,
    )

    partial = pl.pallas_call(
        kernel,
        out_shape=jax.ShapeDtypeStruct((num_shards, 1, 1), jnp.float32),
        grid_spec=pltpu.PrefetchScalarGridSpec(
            num_scalar_prefetch=0,
            grid=(num_shards, tiles_per_shard),
            in_specs=in_specs,
            # Leading shard dim squeezed; (1,1) tail equals the full array dims.
            out_specs=pl.BlockSpec((None, 1, 1), lambda p, i: (p, 0, 0)),
        ),
        compiler_params=pltpu.CompilerParams(
            dimension_semantics=("parallel", "arbitrary"),
            vmem_limit_bytes=vmem_limit,
        ),
        cost_estimate=cost,
    )(logits_in, targets_in)

    total = jnp.sum(partial)                        # combine per-core partials (f32)
    if reduction == "mean":
        total = total / jnp.float32(n)
    return total


def _focal_loss_ref(logits, targets, gamma=1.5, reduction="mean"):
    """Pure-JAX reference (matches the PyTorch module for alpha=None)."""
    logits = logits.astype(jnp.float32)
    lse = jax.nn.logsumexp(logits, axis=-1)
    tgt = jnp.take_along_axis(logits, targets[:, None].astype(jnp.int32),
                              axis=-1)[:, 0]
    ce = lse - tgt
    pt = jnp.exp(-ce)
    fl = (1.0 - pt) ** gamma * ce
    return jnp.mean(fl) if reduction == "mean" else jnp.sum(fl)


if __name__ == "__main__":
    key = jax.random.PRNGKey(0)
    k1, k2, k3, k4 = jax.random.split(key, 4)

    # Small-C (transposed, batch-on-lanes) path: 300 samples x 8 classes,
    # tile_n=128 -> 3 tiles -> grid (2, 2): exercises the megacore shard split,
    # the clamped duplicate tile and the ragged last tile.
    N, C = 300, 8
    logits = jax.random.normal(k1, (N, C), dtype=jnp.float32)
    targets = jax.random.randint(k2, (N,), 0, C, dtype=jnp.int32)

    out = focal_loss(logits, targets, tile_n=128)
    jax.block_until_ready(out)
    ref = _focal_loss_ref(logits, targets)
    assert jnp.allclose(out, ref, atol=1e-5, rtol=1e-5), (out, ref)

    # bf16 ingestion (cast happens on-chip; HBM traffic halves).
    logits_bf16 = logits.astype(jnp.bfloat16)
    out_bf16 = focal_loss(logits_bf16, targets, tile_n=128)
    jax.block_until_ready(out_bf16)
    ref_bf16 = _focal_loss_ref(logits_bf16.astype(jnp.float32), targets)
    assert jnp.allclose(out_bf16, ref_bf16, atol=1e-5, rtol=1e-5), (out_bf16, ref_bf16)

    # Auto tile size + reduction='sum' (single full-extent block).
    out_sum = focal_loss(logits, targets, reduction="sum")
    jax.block_until_ready(out_sum)
    ref_sum = _focal_loss_ref(logits, targets, reduction="sum")
    assert jnp.allclose(out_sum, ref_sum, atol=1e-4, rtol=1e-5), (out_sum, ref_sum)

    # Large-C (classes-on-lanes) path: C >= 128, non-multiple of 128.
    N2, C2 = 272, 160
    logits2 = jax.random.normal(k3, (N2, C2), dtype=jnp.float32)
    targets2 = jax.random.randint(k4, (N2,), 0, C2, dtype=jnp.int32)
    out2 = focal_loss(logits2, targets2, tile_n=64)     # 5 tiles -> grid (2, 3)
    jax.block_until_ready(out2)
    ref2 = _focal_loss_ref(logits2, targets2)
    assert jnp.allclose(out2, ref2, atol=1e-5, rtol=1e-5), (out2, ref2)

    print("KERNEL_OK")
</pallas_src>

<mosaic_0001>
module attributes {stable_mosaic.version = 11 : i64} {
  func.func @kernel(%arg0: i32, %arg1: i32, %arg2: memref<8x128xf32, #tpu.memory_space<vmem>>, %arg3: memref<1x128xi32, #tpu.memory_space<vmem>>, %arg4: memref<1x1x1xf32, #tpu.memory_space<vmem>>) attributes {dimension_semantics = [#tpu.dimension_semantics<parallel>, #tpu.dimension_semantics<arbitrary>], iteration_bounds = array<i64: 2, 2>, scalar_prefetch = 0 : i64, scratch_operands = 0 : i64, tpu.core_type = #tpu.core_type<tc>, window_params = [{transform_indices = @transform_0, window_bounds = array<i64: 8, 128>}, {transform_indices = @transform_1, window_bounds = array<i64: 1, 128>}, {transform_indices = @transform_2, window_bounds = array<i64: 1, 1, 1>}]} {
    %c0_i32 = arith.constant 0 : i32
    %0 = arith.cmpi eq, %arg1, %c0_i32 : i32
    %1 = arith.extui %0 : i1 to i32
    %c0_i32_0 = arith.constant 0 : i32
    %2 = arith.cmpi ne, %1, %c0_i32_0 : i32
    scf.if %2 {
      %cst_18 = arith.constant 0.000000e+00 : f32
      %53 = vector.broadcast %cst_18 : f32 to vector<1x1xf32>
      %c0_19 = arith.constant 0 : index
      %c0_20 = arith.constant 0 : index
      %c0_21 = arith.constant 0 : index
      %54 = vector.load %arg4[%c0_19, %c0_20, %c0_21] : memref<1x1x1xf32, #tpu.memory_space<vmem>>, vector<1x1x1xf32>
      %55 = vector.shape_cast %54 : vector<1x1x1xf32> to vector<1x1xf32>
      %56 = vector.shape_cast %53 : vector<1x1xf32> to vector<1x1x1xf32>
      tpu.vector_store %arg4[%c0_19, %c0_20, %c0_21], %56 {strides = array<i32>} : memref<1x1x1xf32, #tpu.memory_space<vmem>>, vector<1x1x1xf32>,
    } else {
    }
    %c0 = arith.constant 0 : index
    %c0_1 = arith.constant 0 : index
    %3 = vector.load %arg2[%c0, %c0_1] : memref<8x128xf32, #tpu.memory_space<vmem>>, vector<8x128xf32>
    %c0_2 = arith.constant 0 : index
    %c0_3 = arith.constant 0 : index
    %4 = vector.load %arg3[%c0_2, %c0_3] : memref<1x128xi32, #tpu.memory_space<vmem>>, vector<1x128xi32>
    %cst = arith.constant dense<0xFF800000> : vector<128xf32>
    %5 = vector.multi_reduction <maximumf>, %3, %cst [0] : vector<8x128xf32> to vector<128xf32>
    %6 = vector.shape_cast %5 : vector<128xf32> to vector<1x128xf32>
    %7 = vector.broadcast %6 : vector<1x128xf32> to vector<8x128xf32>
    %8 = arith.subf %3, %7 : vector<8x128xf32>
    %9 = math.exp %8 : vector<8x128xf32>
    %cst_4 = arith.constant dense<0.000000e+00> : vector<128xf32>
    %10 = vector.multi_reduction <add>, %9, %cst_4 [0] : vector<8x128xf32> to vector<128xf32>
    %11 = vector.shape_cast %10 : vector<128xf32> to vector<1x128xf32>
    %12 = tpu.iota {dimensions = array<i32: 0>} : vector<8x1xi32>
    %13 = vector.broadcast %12 : vector<8x1xi32> to vector<8x128xi32>
    %14 = vector.broadcast %4 : vector<1x128xi32> to vector<8x128xi32>
    %15 = arith.cmpi eq, %13, %14 : vector<8x128xi32>
    %cst_5 = arith.constant 0.000000e+00 : f32
    %16 = vector.broadcast %cst_5 : f32 to vector<8x128xf32>
    %17 = arith.select %15, %8, %16 : vector<8x128xi1>, vector<8x128xf32>
    %cst_6 = arith.constant dense<0.000000e+00> : vector<128xf32>
    %18 = vector.multi_reduction <add>, %17, %cst_6 [0] : vector<8x128xf32> to vector<128xf32>
    %19 = vector.shape_cast %18 : vector<128xf32> to vector<1x128xf32>
    %20 = math.log %11 : vector<1x128xf32>
    %21 = arith.subf %20, %19 : vector<1x128xf32>
    %cst_7 = arith.constant 0.000000e+00 : f32
    %22 = vector.broadcast %cst_7 : f32 to vector<1x128xf32>
    %23 = arith.subf %22, %21 : vector<1x128xf32>
    %24 = math.exp %23 : vector<1x128xf32>
    %cst_8 = arith.constant 1.000000e+00 : f32
    %25 = vector.broadcast %cst_8 : f32 to vector<1x128xf32>
    %26 = arith.subf %25, %24 : vector<1x128xf32>
    %cst_9 = arith.constant 0.000000e+00 : f32
    %27 = vector.broadcast %cst_9 : f32 to vector<1x128xf32>
    %28 = arith.maximumf %26, %27 : vector<1x128xf32>
    %29 = math.sqrt %28 : vector<1x128xf32>
    %30 = arith.mulf %28, %29 : vector<1x128xf32>
    %31 = arith.mulf %30, %21 : vector<1x128xf32>
    %c2_i32 = arith.constant 2 : i32
    %32 = arith.muli %arg0, %c2_i32 : i32
    %33 = arith.addi %32, %arg1 : i32
    %c128_i32 = arith.constant 128 : i32
    %34 = arith.muli %33, %c128_i32 : i32
    %35 = tpu.iota {dimensions = array<i32: 1>} : vector<1x128xi32>
    %36 = vector.broadcast %34 : i32 to vector<1x128xi32>
    %37 = arith.addi %36, %35 : vector<1x128xi32>
    %c300_i32 = arith.constant 300 : i32
    %38 = vector.broadcast %c300_i32 : i32 to vector<1x128xi32>
    %39 = arith.cmpi slt, %37, %38 : vector<1x128xi32>
    %cst_10 = arith.constant 0.000000e+00 : f32
    %40 = vector.broadcast %cst_10 : f32 to vector<1x128xf32>
    %41 = arith.select %39, %31, %40 : vector<1x128xi1>, vector<1x128xf32>
    %c0_11 = arith.constant 0 : index
    %c0_12 = arith.constant 0 : index
    %c0_13 = arith.constant 0 : index
    %42 = vector.load %arg4[%c0_11, %c0_12, %c0_13] : memref<1x1x1xf32, #tpu.memory_space<vmem>>, vector<1x1x1xf32>
    %43 = vector.shape_cast %42 : vector<1x1x1xf32> to vector<1x1xf32>
    %44 = vector.shape_cast %41 : vector<1x128xf32> to vector<1x1x128xf32>
    %cst_14 = arith.constant dense<0.000000e+00> : vector<1xf32>
    %45 = vector.multi_reduction <add>, %44, %cst_14 [1, 2] : vector<1x1x128xf32> to vector<1xf32>
    %46 = vector.shape_cast %45 : vector<1xf32> to vector<1x1x1xf32>
    %47 = vector.extract %46[0, 0, 0] : f32 from vector<1x1x1xf32>
    %48 = vector.broadcast %47 : f32 to vector<1x1xf32>
    %49 = arith.addf %43, %48 : vector<1x1xf32>
    %c0_15 = arith.constant 0 : index
    %c0_16 = arith.constant 0 : index
    %c0_17 = arith.constant 0 : index
    %50 = vector.load %arg4[%c0_15, %c0_16, %c0_17] : memref<1x1x1xf32, #tpu.memory_space<vmem>>, vector<1x1x1xf32>
    %51 = vector.shape_cast %50 : vector<1x1x1xf32> to vector<1x1xf32>
    %52 = vector.shape_cast %49 : vector<1x1xf32> to vector<1x1x1xf32>
    tpu.vector_store %arg4[%c0_15, %c0_16, %c0_17], %52 {strides = array<i32>} : memref<1x1x1xf32, #tpu.memory_space<vmem>>, vector<1x1x1xf32>,
    return
  }
  func.func @transform_0(%arg0: i32, %arg1: i32) -> (i32, i32) {
    %c2_i32 = arith.constant 2 : i32
    %0 = arith.muli %arg0, %c2_i32 : i32
    %1 = arith.addi %0, %arg1 : i32
    %c2_i32_0 = arith.constant 2 : i32
    %2 = arith.minsi %1, %c2_i32_0 : i32
    %c0_i32 = arith.constant 0 : i32
    %c0_i32_1 = arith.constant 0 : i32
    return %c0_i32, %2 : i32, i32
  }
  func.func @transform_1(%arg0: i32, %arg1: i32) -> (i32, i32) {
    %c2_i32 = arith.constant 2 : i32
    %0 = arith.muli %arg0, %c2_i32 : i32
    %1 = arith.addi %0, %arg1 : i32
    %c2_i32_0 = arith.constant 2 : i32
    %2 = arith.minsi %1, %c2_i32_0 : i32
    %c0_i32 = arith.constant 0 : i32
    %c0_i32_1 = arith.constant 0 : i32
    return %c0_i32, %2 : i32, i32
  }
  func.func @transform_2(%arg0: i32, %arg1: i32) -> (i32, i32, i32) {
    %c0_i32 = arith.constant 0 : i32
    %c0_i32_0 = arith.constant 0 : i32
    %c0_i32_1 = arith.constant 0 : i32
    return %arg0, %c0_i32, %c0_i32_0 : i32, i32, i32
  }
}

</mosaic_0001>

<bundles_post_ra>
// kernel: tpu_custom_call.1
= control target key start
LH: loop header
LB: loop body
LE: loop exit
PB: predicated region body
PF: predicated region fallthrough
CT: control target
= control target key end

     0   :  { %7 = vsyncpa [#allocation3], 0  ;;  %s767_s0 = inlined_call_operand.hbm [shape: f32[8,300], index: 0, kind: input, shape index: {}]   ;;  %s768_s1 = inlined_call_operand.vmem [shape: s32[1,300], index: 1, kind: input, shape index: {}]   ;;  %s769_s2 = inlined_call_operand.vmem [shape: f32[2,1,1], index: 2, kind: output, shape index: {}]  }
   0x1   :  { %9 = vsyncpa [#allocation3 + $0x1], 0  ;;  %s605_s9 = smov 0   ;;  %s607_s10 = smov 0  }
   0x2   :  { %s609_s11 = smov 0   ;;  %s611_s12 = smov 0  }
   0x3   :  { %s613_s13 = smov 0   ;;  %s615_s14 = smov 0  }
   0x4   :  { %s617_s15 = smov 0   ;;  %s619_s16 = smov 0  }
   0x5 LB: > { %s385_s17 = sadd.s32 4294967295, %s586_s16   ;;  %s24_s18 = sadd.s32 1, %s578_s14  ;;  %s586_s16 = sphi %s619_s16, %s15_s16   ;;  %s582_s15 = sphi %s617_s15, %s781_s15   ;;  %s578_s14 = sphi %s615_s14, %s780_s14   ;;  %s574_s13 = sphi %s613_s13, %s779_s13   ;;  %s570_s12 = sphi %s611_s12, %s778_s12   ;;  %s566_s11 = sphi %s609_s11, %s777_s11   ;;  %s562_s10 = sphi %s607_s10, %s776_s10   ;;  %s558_s9 = sphi %s605_s9, %s775_s9  }
   0x6   : > { %p25_p0 = scmp.ge.s32.totalorder %s24_s18, 2  ;;  %s27_s19 = sadd.s32 1, %s582_s15 }
   0x7   : > { %s387_s20 = sshll.u32 %s582_s15, 1  ;;  %s42_s21 = sadd.s32 1, %s566_s11 }
   0x8   : > { %s783_s18 = smov (%p25_p0, %s24_s18), 0  ;;  %s785_s19 = smov (!%p25_p0, %s27_s19), %s582_s15 }
   0x9   : > { %s32_s22 = sadd.s32 %s578_s14, %s387_s20  ;;  %p49_p1 = scmp.ne.s32.totalorder %s566_s11, %s562_s10 }
   0xa   : > { %p29_p2 = scmp.ge.s32.totalorder %s785_s19, 2  ;;  %p33_p3 = scmp.lt.s32.totalorder %s32_s22, 2 }
   0xb   : > { %p50_p4 = scmp.eq.s32.totalorder %s586_s16, 0  ;;  %p55_p5 = scmp.ne.s32.totalorder %s562_s10, %s558_s9 }
   0xc   : > { %s787_s19 = smov (%p29_p2, %s785_s19), 0  ;;  %s789_s22 = smov (!%p33_p3, %s32_s22), 2 }
   0xd   : > { %s388_s23 = sshll.u32 %s787_s19, 1  ;;  %p659_p6 = por %p50_p4, %p49_p1 }
   0xe   : > { %s36_s25 = sadd.s32 %s388_s23, %s783_s18  ;;  %p56_p7 = scmp.eq.s32.totalorder %s385_s17, 0 }
   0xf   : > { %p37_p8 = scmp.lt.s32.totalorder %s36_s25, 2  ;;  %p416_p10 = scmp.lt.s32.totalorder %s586_s16, 4 }
  0x10   : > { %p664_p9 = por %p56_p7, %p55_p5  ;;  %s139_s27 = sand.u32 1, %s566_s11  }
  0x11   : > { %s791_s25 = smov (!%p37_p8, %s36_s25), 2  ;;  %s395_s28 = sshll.u32 %s789_s22, 7 }
  0x12   : > { %s39_s29 = ssub.s32 %s789_s22, %s791_s25  ;;  %s393_s30 = sshll.u32 %s139_s27, 3 }
  0x13   : > { %p40_p11 = scmp.eq.s32.totalorder %s39_s29, 0  ;;  %s673_s5 = scalar_lea.hbm %s767_s0, %s395_s28 }
  0x14   : > { %s143_s7 = scalar_lea.vmem [#allocation2], %s393_s30  ;;  %p680_p12 = pnand %p416_p10, %p659_p6 }
  0x15   : > { %s676_s6 = scalar_select %p40_p11, %s566_s11, %s42_s21  }
  0x16   : > { %s154_s8 = sshll.u32 %s143_s7, 4  ;;  %s140_s17 = scalar_lea.sflag [#allocation3], %s139_s27  ;;  %s684_s8 = int_to_ptr.vmem [resolvable:$true] %s154_s8 }
  0x17   : > { %s490_s20 = scalar_lea.hbm %s673_s5, 128  ;;  %p492_p2 = pneg %p680_p12 }
  0x18   : > { %p491_p1 = scmp.ne.s32.totalorder %s673_s5, %s490_s20  ;;  %s495_s23 = scalar_lea.hbm %s767_s0, 384 }
  0x19   : > { %p496_p5 = scmp.lt.u32.totalorder %s673_s5, %s767_s0  ;;  %p497_p6 = scmp.lt.u32.totalorder %s495_s23, %s490_s20 }
  0x1a   : > { %p493_p3 = pnand %p492_p2, %p491_p1  ;;  %p499_p8 = scmp.lt.u32.totalorder %s490_s20, %s673_s5 }
  0x1b   : > { %p498_p7 = por %p497_p6, %p496_p5 }
  0x1c   : > { %p494_p4 = pneg %p493_p3 }
  0x1d   : > { %p500_p10 = por %p499_p8, %p498_p7 }
  0x1f   : > { %p501_p11 = pnand %p500_p10, %p494_p4 }
  0x21   : > { %504 = shalt.err (!%p501_p11)
}
  0x22   : > { %s505_s27 = scalar_lea.vmem %s684_s8, 128  ;;  %s588_s28 = smov [#allocation2]  }
  0x23   : > { %p506_p1 = scmp.ne.s32.totalorder %s684_s8, %s505_s27  ;;  %s510_s29 = sshll.u32 %s588_s28, 4  ;;  %s511_s29 = int_to_ptr.vmem [resolvable:$false] %s510_s29 }
  0x24   : > { %s512_s30 = scalar_lea.vmem %s511_s29, 256  ;;  %p513_p0 = scmp.lt.s32.totalorder %s684_s8, %s511_s29 }
  0x25   : > { %p508_p3 = pnand %p506_p1, %p492_p2  ;;  %p514_p5 = scmp.lt.s32.totalorder %s512_s30, %s505_s27 }
  0x27   : > { %p509_p13 = pneg %p508_p3  ;;  %p515_p6 = por %p514_p5, %p513_p0 }
  0x29   : > { %p516_p7 = pnand %p515_p6, %p509_p13 }
  0x2b   : > { %519 = shalt.err (!%p516_p7)
}
  0x2c   : > { %415 = dma.hbm_to_vmem [thread:$0]  (!%p680_p12), %s673_s5, 128, %s684_s8, %s140_s17  }
  0x2d   : > { %p773_p4 = scmp.lt.s32.totalorder %s586_s16, 5  ;;  %p774_p8 = scmp.ge.s32.totalorder %s586_s16, 1 }
  0x2f   : > { %p174_p2 = pnand %p774_p8, %p773_p4 }
  0x30   : > { %s179_s3 = sand.u32 (!%p174_p2), 1, %s562_s10  }
  0x31   : > { %177 = sbr.rel (%p174_p2) target bundleno = 370 (0x172), region = 28  ;;  %s397_s4 = sshll.u32 (!%p174_p2), %s179_s3, 3 }
  0x32   : > { %s180_s7 = scalar_lea.sflag (!%p174_p2), [#allocation3], %s179_s3  ;;  %s183_s20 = scalar_lea.vmem (!%p174_p2), [#allocation2], %s397_s4 }
  0x38   : > { %553 = dma.done.wait (%p664_p9), %s180_s7, 128  }
  0x39   : > { %555 = vsyncadd (%p664_p9), %s180_s7, 4294967168  ;;  %s398_s5 = sshll.u32 %s574_s13, 1  ;;  %p224_p12 = scmp.lt.s32.totalorder %s574_s13, 1 }
  0x3a   : > { %s725_s8 = sadd.s32 %s570_s12, %s398_s5  ;;  %p402_p9 = scmp.ne.s32.totalorder %s570_s12, 0 }
  0x3b   : > { %p215_p13 = scmp.lt.s32.totalorder %s725_s8, 2  ;;  %s793_s13 = smov (!%p224_p12, %s574_s13), 1  ;;  %vm231_vm0 = vcmask (!%p402_p9), 0   ;;  %v589_v0 = vmov (!%p402_p9), 0.0  }
  0x3c   : > { %s733_s22 = scalar_lea.vmem %s769_s2, %s793_s13  ;;  %230 = sbr.rel (%p402_p9) target bundleno = 67 (0x43), region = 36 }
  0x3d   : > { %s216_s9 = scalar_select %p215_p13, %s725_s8, 2 }
  0x3e   : > { %232 = vst.msk [vmem:[%s733_s22] sm:$0x1] (!%p402_p9), %vm231_vm0, %v589_v0 }
  0x3f   : > { %s795_s9 = smov (!%p215_p13, %s216_s9), 2 }
  0x40   : > { %s219_s24 = scalar_lea.vmem %s768_s1, %s795_s9 }
  0x43 PF: > { %v233_v1 = vld [vmem:[%s183_s20] sm:$0xff]  ;;  %v250_v10 = vlaneseq  ;;  %s405_s12 = sshll.u32 %s725_s8, 7  ;;  %vm291_vm5 = vcmask 1040384   ;;  %vm304_vm6 = vcmask 0  }
  0x44   : > { %v235_v2 = vrot.slane %v233_v1, 4  ;;  %v403_v12 = vld [vmem:[%s219_s24] ss:$0 sm:$0xff]  ;;  %v286_v36 = vstv %s405_s12 }
  0x45   : > { %v251_v11 = vshrl.u32 %v250_v10, 7  ;;  %v285_v35 = vand.u32 127, %v250_v10  ;;  %v290_v54 = vld [vmem:[%s733_s22] sm:$0x1] }
  0x46   : > { %v236_v3 = vmax.f32 %v233_v1, %v235_v2 }
  0x47   : > { %vm256_vm1 = vcmp.eq.s32.totalorder %v251_v11, %v403_v12  ;;  %v287_v40 = vadd.s32 %v286_v36, %v285_v35 }
  0x48   : > { %v237_v4 = vrot.slane %v236_v3, 2 }
  0x49   : > { %vm288_vm4 = vcmp.lt.s32.totalorder %v287_v40, 300 }
  0x4a   : > { %v238_v5 = vmax.f32 %v236_v3, %v237_v4 }
  0x4c   : > { %v239_v6 = vrot.slane %v238_v5, 1 }
  0x4e   : > { %v240_v7 = vmax.f32 %v238_v5, %v239_v6 }
  0x50   : > { %v241_v8 = vsub.f32 %v233_v1, %v240_v7 }
  0x52   : > { %v242_v9 = vmul.f32 1.442695, %v241_v8  ;;  %v257_v13 = vsel %vm256_vm1, %v241_v8, 0.0 }
  0x53   : > { %v258_v16 = vrot.slane %v257_v13, 4 }
  0x54   : > { %482 = vpow2.f32 %v242_v9 }
  0x55   : > { %v259_v19 = vadd.f32 %v258_v16, %v257_v13 }
  0x57   : > { %v260_v22 = vrot.slane %v259_v19, 2 }
  0x59   : > { %v261_v24 = vadd.f32 %v260_v22, %v259_v19 }
  0x5b   : > { %v262_v25 = vrot.slane %v261_v24, 1 }
  0x5d   : > { %v263_v26 = vadd.f32 %v262_v25, %v261_v24 }
  0x5e   : > { %v483_v14 = vpop.eup %482 }
  0x5f   : > { %v244_v15 = vrot.slane %v483_v14, 4 }
  0x61   : > { %v245_v17 = vadd.f32 %v483_v14, %v244_v15 }
  0x63   : > { %v246_v18 = vrot.slane %v245_v17, 2 }
  0x65   : > { %v247_v20 = vadd.f32 %v246_v18, %v245_v17 }
  0x67   : > { %v248_v21 = vrot.slane %v247_v20, 1 }
  0x69   : > { %v249_v23 = vadd.f32 %v248_v21, %v247_v20 }
  0x6b   : > { %484 = vlog2.f32 %v249_v23 }
  0x75   : > { %v485_v27 = vpop.eup %484 }
  0x76   : > { %v265_v28 = vmul.f32 0.6931472, %v485_v27 }
  0x78   : > { %v266_v29 = vsub.f32 %v265_v28, %v263_v26 }
  0x7a   : > { %v267_v30 = vsub.f32 0.0, %v266_v29 }
  0x7c   : > { %v268_v31 = vmul.f32 1.442695, %v267_v30 }
  0x7e   : > { %486 = vpow2.f32 %v268_v31 }
  0x88   : > { %v487_v32 = vpop.eup %486 }
  0x89   : > { %v270_v33 = vsub.f32 1.0, %v487_v32 }
  0x8b   : > { %v271_v34 = vmax.f32 %v270_v33, 0.0 }
  0x8d   : > { %488 = vrsqrt.f32 %v271_v34  ;;  %vm274_vm2 = vcmp.eq.f32.partialorder %v271_v34, inf  ;;  %v277_v38 = vand.u32 2147483648, %v271_v34  ;;  %vm276_vm3 = vcmp.eq.f32.partialorder %v271_v34, 0.0 }
  0x97   : > { %v489_v37 = vpop.eup %488 }
  0x98   : > { %v273_v39 = vmul.f32 %v489_v37, %v271_v34 }
  0x9a   : > { %v275_v41 = vsel %vm274_vm2, %v271_v34, %v273_v39 }
  0x9b   : > { %v278_v42 = vsel %vm276_vm3, %v277_v38, %v275_v41 }
  0x9c   : > { %v279_v43 = vmul.f32 %v278_v42, %v271_v34 }
  0x9e   : > { %v280_v44 = vmul.f32 %v279_v43, %v266_v29 }
  0xa0   : > { %v289_v45 = vsel %vm288_vm4, %v280_v44, 0.0 }
  0xa1   : > { %v292_v46 = vsel %vm291_vm5, %v289_v45, 0.0 }
  0xa2   : > { %293 = vadd.xlane.f32.xlu0 %v292_v46 }
 0x12f   : > { %v294_v47 = vpop.xlane.xlu0 %293 }
 0x130   : > { %v295_v48 = vrot.slane %v294_v47, 4 }
 0x132   : > { %v296_v49 = vadd.f32 %v295_v48, %v294_v47 }
 0x134   : > { %v297_v50 = vrot.slane %v296_v49, 2 }
 0x136   : > { %v298_v51 = vadd.f32 %v297_v50, %v296_v49 }
 0x138   : > { %v299_v52 = vrot.slane %v298_v51, 1 }
 0x13a   : > { %v300_v53 = vadd.f32 %v299_v52, %v298_v51 }
 0x13c   : > { %408 = vpush %v300_v53 }
 0x16d   : > { %s409_s13 = spop %408 }
 0x16e   : > { %v302_v55 = vstv %s409_s13 }
 0x16f   : > { %v303_v56 = vadd.f32 %v302_v55, %v290_v54 }
 0x171   : > { %305 = vst.msk [vmem:[%s733_s22] sm:$0x1] %vm304_vm6, %v303_v56 }
 0x172 PF: > { %s15_s16 = sadd.s32 1, %s586_s16   ;;  %s775_s9 = smov %s562_s10 }
 0x173   : > { %p12_p0 = scmp.ge.s32.totalorder %s15_s16, 6   ;;  %s776_s10 = smov %s566_s11 }
 0x174   : > { %s777_s11 = smov %s676_s6  ;;  %s778_s12 = smov %s578_s14 }
 0x175   : > { %s779_s13 = smov %s582_s15  ;;  %s780_s14 = smov %s783_s18 }
 0x176   : > { %s781_s15 = smov %s787_s19  ;;  %14 = sbr.rel (!%p12_p0) target bundleno = 5 (0x5), region = 75 }
 0x17d   :  { %323 = vsyncpa [#allocation3], 1 }
 0x17e   :  { %325 = vsyncpa [#allocation3 + $0x1], 1 }

</bundles_post_ra>
